<compile_context>
chip_gen: v6e
topology: v6e:2x2x1
jax: 0.10.0
libtpu: 0.0.40
codegen_flags: <defaults>
</compile_context>

<pallas_src>
import functools
import math

import jax
import jax.numpy as jnp
from jax.experimental import pallas as pl
from jax.experimental.pallas import tpu as pltpu

_LANE = 128
_SUB = 8


def _round_up(x, m):
    return ((x + m - 1) // m) * m


def _dice_channel_kernel(pred_ref, y_ref, dice_ref,
                         pred_acc, y_acc, inter_acc,
                         *, ignore_empty, assume_binary):
    """Streams one spatial chunk of (b, c); finalizes dice on the last chunk."""
    r = pl.program_id(2)

    @pl.when(r == 0)
    def _init():
        pred_acc[...] = jnp.zeros_like(pred_acc)
        y_acc[...] = jnp.zeros_like(y_acc)
        inter_acc[...] = jnp.zeros_like(inter_acc)

    pred = pred_ref[0, 0]                      # (R_CHUNK, 128), native dtype
    yv = y_ref[0, 0].astype(jnp.float32)       # (R_CHUNK, 128), f32

    if assume_binary:
        # One-hot / binarized inputs: sum(pred) == count(pred != 0) and
        # sum(pred * y) == sum(masked_select(y, pred)); skip compare/select.
        pred_f = pred.astype(jnp.float32)
        inter_f = pred_f * yv
    else:
        # Exact PyTorch semantics: x_pred = y_pred[b, c].bool()
        pred_mask = pred != 0
        pred_f = pred_mask.astype(jnp.float32)
        inter_f = jnp.where(pred_mask, yv, jnp.float32(0.0))

    rc = pred.shape[0]
    # Fold chunk rows onto the (8, 128) accumulators: pure VPU vreg adds,
    # no per-chunk cross-lane/sublane reduction.  Distributing the counts over
    # 1024 partial slots also keeps each slot far below f32's 2^24 integer
    # representability limit even for 256^3 volumes.
    pred_acc[...] += pred_f.reshape(rc // _SUB, _SUB, _LANE).sum(axis=0)
    y_acc[...] += yv.reshape(rc // _SUB, _SUB, _LANE).sum(axis=0)
    inter_acc[...] += inter_f.reshape(rc // _SUB, _SUB, _LANE).sum(axis=0)

    @pl.when(r == pl.num_programs(2) - 1)
    def _finalize():
        pred_sum = jnp.sum(pred_acc[...])      # torch.sum(y_pred)  (bool count)
        y_sum = jnp.sum(y_acc[...])            # y_o = torch.sum(y)
        inter = jnp.sum(inter_acc[...])        # sum(masked_select(y, y_pred))

        denom = y_sum + pred_sum
        # Note: when y_sum == 0 and pred_sum == 0 this is 0/0 = NaN; it is
        # intentionally produced and then discarded by the jnp.where below.
        dice_pos = jnp.float32(2.0) * inter / denom
        if ignore_empty:
            empty_val = jnp.float32(jnp.nan)
        else:
            empty_val = jnp.where(denom <= 0.0, jnp.float32(1.0), jnp.float32(0.0))
        dice = jnp.where(y_sum > 0.0, dice_pos, empty_val)
        dice_ref[...] = jnp.full((1, 1, 1, _LANE), dice, dtype=jnp.float32)


def _per_channel_dice(y_pred, y, *, ignore_empty=True, assume_binary=False,
                      max_chunk_rows=2048):
    """Returns per (batch, channel) dice scores, shape (B, C) float32."""
    B, C = y_pred.shape[0], y_pred.shape[1]
    S = math.prod(y_pred.shape[2:])

    p = y_pred.reshape(B, C, S)
    t = y.reshape(B, C, S)

    # Row-chunk size: multiple of 32 rows so f32/bf16/int8 all tile legally;
    # capped at max_chunk_rows so one double-buffered input pair stays around
    # 1-4 MiB of VMEM (well inside the 16 MiB v5e default scoped limit).
    R = -(-S // _LANE)
    r_chunk = min(max_chunk_rows, _round_up(max(R, 1), 32))
    R_pad = _round_up(R, r_chunk)
    S_pad = R_pad * _LANE

    # Zero padding is numerically neutral: padded pred contributes nothing to
    # the foreground count / intersection, padded y nothing to y_sum.
    if S_pad != S:
        p = jnp.pad(p, ((0, 0), (0, 0), (0, S_pad - S)))
        t = jnp.pad(t, ((0, 0), (0, 0), (0, S_pad - S)))
    p = p.reshape(B, C, R_pad, _LANE)
    t = t.reshape(B, C, R_pad, _LANE)
    n_chunks = R_pad // r_chunk

    kernel = functools.partial(_dice_channel_kernel,
                               ignore_empty=ignore_empty,
                               assume_binary=assume_binary)
    out = pl.pallas_call(
        kernel,
        out_shape=jax.ShapeDtypeStruct((B, C, 1, _LANE), jnp.float32),
        grid_spec=pltpu.PrefetchScalarGridSpec(
            num_scalar_prefetch=0,
            grid=(B, C, n_chunks),
            in_specs=[
                pl.BlockSpec((1, 1, r_chunk, _LANE), lambda b, c, r: (b, c, r, 0)),
                pl.BlockSpec((1, 1, r_chunk, _LANE), lambda b, c, r: (b, c, r, 0)),
            ],
            out_specs=pl.BlockSpec((1, 1, 1, _LANE), lambda b, c, r: (b, c, 0, 0)),
            scratch_shapes=[
                pltpu.VMEM((_SUB, _LANE), jnp.float32),
                pltpu.VMEM((_SUB, _LANE), jnp.float32),
                pltpu.VMEM((_SUB, _LANE), jnp.float32),
            ]),
        compiler_params=pltpu.CompilerParams(
            dimension_semantics=("parallel", "parallel", "arbitrary")),
    )(p, t)
    return out[:, :, 0, 0]


def _do_metric_reduction_mean(data):
    """MONAI-style do_metric_reduction(..., 'mean'): nan-aware 2-step mean."""
    nans = jnp.isnan(data)
    not_nans = (~nans).astype(jnp.float32)
    f = jnp.where(nans, jnp.float32(0.0), data)
    # average over channels per sample (ignoring NaN channels)
    not_nans_c = not_nans.sum(axis=1)                                   # (B,)
    f = jnp.where(not_nans_c > 0, f.sum(axis=1) / not_nans_c, 0.0)      # (B,)
    # average over batch of samples that had at least one valid channel
    not_nans_b = (not_nans_c > 0).astype(jnp.float32).sum(axis=0)       # ()
    f = jnp.where(not_nans_b > 0, f.sum(axis=0) / not_nans_b, 0.0)      # ()
    return f, not_nans_b


def dice_metric_3d(y_pred, y, include_background=True, reduction='mean',
                   get_not_nans=False, ignore_empty=True, assume_binary=False):
    """Forward pass of DiceMetric3d (default config path)."""
    n_pred_ch = y_pred.shape[1]
    assert n_pred_ch > 1, "this kernel implements the multi-channel path"
    assert reduction == 'mean'

    data = _per_channel_dice(y_pred, y, ignore_empty=ignore_empty,
                             assume_binary=assume_binary)               # (B, C)
    if not include_background:
        data = data[:, 1:]
    f, not_nans = _do_metric_reduction_mean(data)
    return (f, not_nans) if get_not_nans else f


def _dice_reference(y_pred, y, ignore_empty=True):
    """Pure-JAX reference for the per-channel dice (for the self-check)."""
    axes = tuple(range(2, y_pred.ndim))
    pm = y_pred != 0
    yf = y.astype(jnp.float32)
    y_sum = yf.sum(axis=axes)
    pred_sum = pm.astype(jnp.float32).sum(axis=axes)
    inter = jnp.where(pm, yf, 0.0).sum(axis=axes)
    denom = y_sum + pred_sum
    dice_pos = 2.0 * inter / denom
    empty = jnp.float32(jnp.nan) if ignore_empty else jnp.where(
        denom <= 0.0, jnp.float32(1.0), jnp.float32(0.0))
    return jnp.where(y_sum > 0.0, dice_pos, empty)


if __name__ == "__main__":
    key = jax.random.PRNGKey(0)
    B, C, D, H, W = 2, 4, 8, 16, 16
    k1, k2 = jax.random.split(key)

    # Deterministic synthetic segmentation data: one-hot predictions & labels,
    # streamed to the kernel in bf16 (native dtype, no wrapper upcast pass).
    pred_labels = jax.random.randint(k1, (B, D, H, W), 0, C)
    true_labels = jax.random.randint(k2, (B, D, H, W), 0, C)
    y_pred = jax.nn.one_hot(pred_labels, C, axis=1, dtype=jnp.bfloat16)  # (B,C,D,H,W)
    y = jax.nn.one_hot(true_labels, C, axis=1, dtype=jnp.bfloat16)       # (B,C,D,H,W)

    f = dice_metric_3d(y_pred, y)
    f = jax.block_until_ready(f)
    assert f.shape == () and bool(jnp.isfinite(f))

    # Self-check against a pure-JAX reference of the same default config.
    ref_data = _dice_reference(y_pred, y)
    f_ref, _ = _do_metric_reduction_mean(ref_data)
    assert bool(jnp.abs(f - f_ref) < 1e-5), (f, f_ref)

    print("KERNEL_OK")
</pallas_src>

<mosaic_0001>
module attributes {stable_mosaic.version = 11 : i64} {
  func.func @_dice_channel_kernel(%arg0: i32, %arg1: i32, %arg2: i32, %arg3: memref<1x1x32x128xbf16, #tpu.memory_space<vmem>>, %arg4: memref<1x1x32x128xbf16, #tpu.memory_space<vmem>>, %arg5: memref<1x1x1x128xf32, #tpu.memory_space<vmem>>, %arg6: memref<8x128xf32, #tpu.memory_space<vmem>>, %arg7: memref<8x128xf32, #tpu.memory_space<vmem>>, %arg8: memref<8x128xf32, #tpu.memory_space<vmem>>) attributes {dimension_semantics = [#tpu.dimension_semantics<parallel>, #tpu.dimension_semantics<parallel>, #tpu.dimension_semantics<arbitrary>], iteration_bounds = array<i64: 2, 4, 1>, scalar_prefetch = 0 : i64, scratch_operands = 3 : i64, tpu.core_type = #tpu.core_type<tc>, window_params = [{transform_indices = @transform_0, window_bounds = array<i64: 1, 1, 32, 128>}, {transform_indices = @transform_1, window_bounds = array<i64: 1, 1, 32, 128>}, {transform_indices = @transform_2, window_bounds = array<i64: 1, 1, 1, 128>}]} {
    %c0_i32 = arith.constant 0 : i32
    %0 = arith.cmpi eq, %arg2, %c0_i32 : i32
    %1 = arith.extui %0 : i1 to i32
    %c0_i32_0 = arith.constant 0 : i32
    %2 = arith.cmpi ne, %1, %c0_i32_0 : i32
    scf.if %2 {
      %cst_26 = arith.constant 0.000000e+00 : f32
      %32 = vector.broadcast %cst_26 : f32 to vector<8x128xf32>
      %c0_27 = arith.constant 0 : index
      %c0_28 = arith.constant 0 : index
      %33 = vector.load %arg6[%c0_27, %c0_28] : memref<8x128xf32, #tpu.memory_space<vmem>>, vector<8x128xf32>
      tpu.vector_store %arg6[%c0_27, %c0_28], %32 {strides = array<i32>} : memref<8x128xf32, #tpu.memory_space<vmem>>, vector<8x128xf32>,
      %cst_29 = arith.constant 0.000000e+00 : f32
      %34 = vector.broadcast %cst_29 : f32 to vector<8x128xf32>
      %c0_30 = arith.constant 0 : index
      %c0_31 = arith.constant 0 : index
      %35 = vector.load %arg7[%c0_30, %c0_31] : memref<8x128xf32, #tpu.memory_space<vmem>>, vector<8x128xf32>
      tpu.vector_store %arg7[%c0_30, %c0_31], %34 {strides = array<i32>} : memref<8x128xf32, #tpu.memory_space<vmem>>, vector<8x128xf32>,
      %cst_32 = arith.constant 0.000000e+00 : f32
      %36 = vector.broadcast %cst_32 : f32 to vector<8x128xf32>
      %c0_33 = arith.constant 0 : index
      %c0_34 = arith.constant 0 : index
      %37 = vector.load %arg8[%c0_33, %c0_34] : memref<8x128xf32, #tpu.memory_space<vmem>>, vector<8x128xf32>
      tpu.vector_store %arg8[%c0_33, %c0_34], %36 {strides = array<i32>} : memref<8x128xf32, #tpu.memory_space<vmem>>, vector<8x128xf32>,
    } else {
    }
    %c0 = arith.constant 0 : index
    %c0_1 = arith.constant 0 : index
    %c0_2 = arith.constant 0 : index
    %c0_3 = arith.constant 0 : index
    %3 = vector.load %arg3[%c0, %c0_1, %c0_2, %c0_3] : memref<1x1x32x128xbf16, #tpu.memory_space<vmem>>, vector<1x1x32x128xbf16>
    %4 = vector.shape_cast %3 : vector<1x1x32x128xbf16> to vector<32x128xbf16>
    %c0_4 = arith.constant 0 : index
    %c0_5 = arith.constant 0 : index
    %c0_6 = arith.constant 0 : index
    %c0_7 = arith.constant 0 : index
    %5 = vector.load %arg4[%c0_4, %c0_5, %c0_6, %c0_7] : memref<1x1x32x128xbf16, #tpu.memory_space<vmem>>, vector<1x1x32x128xbf16>
    %6 = vector.shape_cast %5 : vector<1x1x32x128xbf16> to vector<32x128xbf16>
    %7 = arith.extf %6 : vector<32x128xbf16> to vector<32x128xf32>
    %cst = arith.constant 0.000000e+00 : bf16
    %8 = vector.broadcast %cst : bf16 to vector<32x128xbf16>
    %9 = arith.cmpf one, %4, %8 : vector<32x128xbf16>
    %10 = arith.extui %9 : vector<32x128xi1> to vector<32x128xi32>
    %11 = arith.sitofp %10 : vector<32x128xi32> to vector<32x128xf32>
    %cst_8 = arith.constant 0.000000e+00 : f32
    %12 = vector.broadcast %cst_8 : f32 to vector<32x128xf32>
    %13 = arith.select %9, %7, %12 : vector<32x128xi1>, vector<32x128xf32>
    %c0_9 = arith.constant 0 : index
    %c0_10 = arith.constant 0 : index
    %14 = vector.load %arg6[%c0_9, %c0_10] : memref<8x128xf32, #tpu.memory_space<vmem>>, vector<8x128xf32>
    %15 = vector.shape_cast %11 : vector<32x128xf32> to vector<4x8x128xf32>
    %cst_11 = arith.constant dense<0.000000e+00> : vector<8x128xf32>
    %16 = vector.multi_reduction <add>, %15, %cst_11 [0] : vector<4x8x128xf32> to vector<8x128xf32>
    %17 = arith.addf %14, %16 : vector<8x128xf32>
    %c0_12 = arith.constant 0 : index
    %c0_13 = arith.constant 0 : index
    %18 = vector.load %arg6[%c0_12, %c0_13] : memref<8x128xf32, #tpu.memory_space<vmem>>, vector<8x128xf32>
    tpu.vector_store %arg6[%c0_12, %c0_13], %17 {strides = array<i32>} : memref<8x128xf32, #tpu.memory_space<vmem>>, vector<8x128xf32>,
    %c0_14 = arith.constant 0 : index
    %c0_15 = arith.constant 0 : index
    %19 = vector.load %arg7[%c0_14, %c0_15] : memref<8x128xf32, #tpu.memory_space<vmem>>, vector<8x128xf32>
    %20 = vector.shape_cast %7 : vector<32x128xf32> to vector<4x8x128xf32>
    %cst_16 = arith.constant dense<0.000000e+00> : vector<8x128xf32>
    %21 = vector.multi_reduction <add>, %20, %cst_16 [0] : vector<4x8x128xf32> to vector<8x128xf32>
    %22 = arith.addf %19, %21 : vector<8x128xf32>
    %c0_17 = arith.constant 0 : index
    %c0_18 = arith.constant 0 : index
    %23 = vector.load %arg7[%c0_17, %c0_18] : memref<8x128xf32, #tpu.memory_space<vmem>>, vector<8x128xf32>
    tpu.vector_store %arg7[%c0_17, %c0_18], %22 {strides = array<i32>} : memref<8x128xf32, #tpu.memory_space<vmem>>, vector<8x128xf32>,
    %c0_19 = arith.constant 0 : index
    %c0_20 = arith.constant 0 : index
    %24 = vector.load %arg8[%c0_19, %c0_20] : memref<8x128xf32, #tpu.memory_space<vmem>>, vector<8x128xf32>
    %25 = vector.shape_cast %13 : vector<32x128xf32> to vector<4x8x128xf32>
    %cst_21 = arith.constant dense<0.000000e+00> : vector<8x128xf32>
    %26 = vector.multi_reduction <add>, %25, %cst_21 [0] : vector<4x8x128xf32> to vector<8x128xf32>
    %27 = arith.addf %24, %26 : vector<8x128xf32>
    %c0_22 = arith.constant 0 : index
    %c0_23 = arith.constant 0 : index
    %28 = vector.load %arg8[%c0_22, %c0_23] : memref<8x128xf32, #tpu.memory_space<vmem>>, vector<8x128xf32>
    tpu.vector_store %arg8[%c0_22, %c0_23], %27 {strides = array<i32>} : memref<8x128xf32, #tpu.memory_space<vmem>>, vector<8x128xf32>,
    %c0_i32_24 = arith.constant 0 : i32
    %29 = arith.cmpi eq, %arg2, %c0_i32_24 : i32
    %30 = arith.extui %29 : i1 to i32
    %c0_i32_25 = arith.constant 0 : i32
    %31 = arith.cmpi ne, %30, %c0_i32_25 : i32
    scf.if %31 {
      %c0_26 = arith.constant 0 : index
      %c0_27 = arith.constant 0 : index
      %32 = vector.load %arg6[%c0_26, %c0_27] : memref<8x128xf32, #tpu.memory_space<vmem>>, vector<8x128xf32>
      %33 = vector.shape_cast %32 : vector<8x128xf32> to vector<1x8x128xf32>
      %cst_28 = arith.constant dense<0.000000e+00> : vector<1xf32>
      %34 = vector.multi_reduction <add>, %33, %cst_28 [1, 2] : vector<1x8x128xf32> to vector<1xf32>
      %35 = vector.shape_cast %34 : vector<1xf32> to vector<1x1x1xf32>
      %36 = vector.extract %35[0, 0, 0] : f32 from vector<1x1x1xf32>
      %c0_29 = arith.constant 0 : index
      %c0_30 = arith.constant 0 : index
      %37 = vector.load %arg7[%c0_29, %c0_30] : memref<8x128xf32, #tpu.memory_space<vmem>>, vector<8x128xf32>
      %38 = vector.shape_cast %37 : vector<8x128xf32> to vector<1x8x128xf32>
      %cst_31 = arith.constant dense<0.000000e+00> : vector<1xf32>
      %39 = vector.multi_reduction <add>, %38, %cst_31 [1, 2] : vector<1x8x128xf32> to vector<1xf32>
      %40 = vector.shape_cast %39 : vector<1xf32> to vector<1x1x1xf32>
      %41 = vector.extract %40[0, 0, 0] : f32 from vector<1x1x1xf32>
      %c0_32 = arith.constant 0 : index
      %c0_33 = arith.constant 0 : index
      %42 = vector.load %arg8[%c0_32, %c0_33] : memref<8x128xf32, #tpu.memory_space<vmem>>, vector<8x128xf32>
      %43 = vector.shape_cast %42 : vector<8x128xf32> to vector<1x8x128xf32>
      %cst_34 = arith.constant dense<0.000000e+00> : vector<1xf32>
      %44 = vector.multi_reduction <add>, %43, %cst_34 [1, 2] : vector<1x8x128xf32> to vector<1xf32>
      %45 = vector.shape_cast %44 : vector<1xf32> to vector<1x1x1xf32>
      %46 = vector.extract %45[0, 0, 0] : f32 from vector<1x1x1xf32>
      %47 = arith.addf %41, %36 : f32
      %cst_35 = arith.constant 2.000000e+00 : f32
      %48 = arith.mulf %cst_35, %46 : f32
      %49 = arith.divf %48, %47 : f32
      %cst_36 = arith.constant 0.000000e+00 : f32
      %50 = arith.cmpf ogt, %41, %cst_36 : f32
      %cst_37 = arith.constant 0x7FC00000 : f32
      %51 = arith.select %50, %49, %cst_37 : f32
      %52 = vector.broadcast %51 : f32 to vector<1x1x1x128xf32>
      %c0_38 = arith.constant 0 : index
      %c0_39 = arith.constant 0 : index
      %c0_40 = arith.constant 0 : index
      %c0_41 = arith.constant 0 : index
      %53 = vector.load %arg5[%c0_38, %c0_39, %c0_40, %c0_41] : memref<1x1x1x128xf32, #tpu.memory_space<vmem>>, vector<1x1x1x128xf32>
      tpu.vector_store %arg5[%c0_38, %c0_39, %c0_40, %c0_41], %52 {strides = array<i32>} : memref<1x1x1x128xf32, #tpu.memory_space<vmem>>, vector<1x1x1x128xf32>,
    } else {
    }
    return
  }
  func.func @transform_0(%arg0: i32, %arg1: i32, %arg2: i32) -> (i32, i32, i32, i32) {
    %c0_i32 = arith.constant 0 : i32
    %c0_i32_0 = arith.constant 0 : i32
    return %arg0, %arg1, %arg2, %c0_i32 : i32, i32, i32, i32
  }
  func.func @transform_1(%arg0: i32, %arg1: i32, %arg2: i32) -> (i32, i32, i32, i32) {
    %c0_i32 = arith.constant 0 : i32
    %c0_i32_0 = arith.constant 0 : i32
    return %arg0, %arg1, %arg2, %c0_i32 : i32, i32, i32, i32
  }
  func.func @transform_2(%arg0: i32, %arg1: i32, %arg2: i32) -> (i32, i32, i32, i32) {
    %c0_i32 = arith.constant 0 : i32
    %c0_i32_0 = arith.constant 0 : i32
    %c0_i32_1 = arith.constant 0 : i32
    return %arg0, %arg1, %c0_i32, %c0_i32_0 : i32, i32, i32, i32
  }
}

</mosaic_0001>

<bundles_post_ra>
// kernel: tpu_custom_call.1
= control target key start
LH: loop header
LB: loop body
LE: loop exit
PB: predicated region body
PF: predicated region fallthrough
CT: control target
= control target key end

     0   :  { %s980_s0 = inlined_call_operand.hbm [shape: bf16[2,4,32,128], index: 0, kind: input, shape index: {}]   ;;  %s981_s1 = inlined_call_operand.hbm [shape: bf16[2,4,32,128], index: 1, kind: input, shape index: {}]   ;;  %s982_s2 = inlined_call_operand.hbm [shape: f32[2,4,1,128], index: 2, kind: output, shape index: {}]  }
   0x1   :  { %985 = sst [smem:[#allocation16_spill]] %s980_s0 }
   0x2   :  { %7 = vsyncpa [#allocation6], 0 }
   0x3   :  { %9 = vsyncpa [#allocation6 + $0x1], 0 }
   0x4   :  { %10 = vsyncpa [#allocation9], 0 }
   0x5   :  { %12 = vsyncpa [#allocation9 + $0x1], 0 }
   0x6   :  { %13 = vsyncpa [#allocation7], 0 }
   0x7   :  { %15 = vsyncpa [#allocation7 + $0x1], 0  ;;  %s790_s9 = smov 0   ;;  %s792_s10 = smov 0  }
   0x8   :  { %s794_s11 = smov 0   ;;  %s796_s12 = smov 0  }
   0x9   :  { %s798_s13 = smov 0   ;;  %s800_s14 = smov 0  }
   0xa   :  { %s802_s15 = smov 0   ;;  %s804_s16 = smov 0  }
   0xb LB: > { %s481_s17 = sadd.s32 4294967295, %s766_s16   ;;  %s482_s18 = sadd.s32 4294967294, %s766_s16   ;;  %s766_s16 = sphi %s804_s16, %s21_s16   ;;  %s762_s15 = sphi %s802_s15, %s1003_s15   ;;  %s758_s14 = sphi %s800_s14, %s1002_s14   ;;  %s754_s13 = sphi %s798_s13, %s1001_s13   ;;  %s750_s12 = sphi %s796_s12, %s1000_s12   ;;  %s746_s11 = sphi %s794_s11, %s999_s11   ;;  %s742_s10 = sphi %s792_s10, %s998_s10   ;;  %s738_s9 = sphi %s790_s9, %s997_s9  }
   0xc   : > { %s36_s19 = sadd.s32 1, %s758_s14  ;;  %s40_s20 = sadd.s32 1, %s762_s15 }
   0xd   : > { %p38_p0 = scmp.ge.s32.totalorder %s36_s19, 4  ;;  %s51_s21 = sadd.s32 1, %s746_s11 }
   0xe   : > { %p58_p1 = scmp.ne.s32.totalorder %s746_s11, %s742_s10  ;;  %p59_p2 = scmp.eq.s32.totalorder %s766_s16, 0 }
   0xf   : > { %s1005_s19 = smov (%p38_p0, %s36_s19), 0  ;;  %s1007_s20 = smov (!%p38_p0, %s40_s20), %s762_s15 }
  0x10   : > { %986 = sst [smem:[#allocation14_spill]] %s1005_s19  ;;  %s45_s22 = ssub.s32 %s758_s14, %s1005_s19 }
  0x11   : > { %p843_p3 = por %p59_p2, %p58_p1  ;;  %p42_p4 = scmp.ge.s32.totalorder %s1007_s20, 2 }
  0x12   : > { %p64_p5 = scmp.ne.s32.totalorder %s742_s10, %s738_s9  ;;  %p65_p6 = scmp.eq.s32.totalorder %s481_s17, 0 }
  0x13   : > { %p120_p7 = scmp.eq.s32.totalorder %s481_s17, 7  ;;  %s1009_s20 = smov (%p42_p4, %s1007_s20), 0 }
  0x14   : > { %988 = sst [smem:[#allocation15_spill]] %s1009_s20  ;;  %p851_p8 = por %p65_p6, %p64_p5 }
  0x15   : > { %p855_p9 = por %p120_p7, %p58_p1  ;;  %s44_s26 = ssub.s32 %s762_s15, %s1009_s20 }
  0x16   : > { %p126_p10 = scmp.eq.s32.totalorder %s482_s18, 7  ;;  %s46_s27 = sor.u32 %s45_s22, %s44_s26 }
  0x17   : > { %p49_p11 = scmp.eq.s32.totalorder %s46_s27, 0  ;;  %p538_p13 = scmp.lt.s32.totalorder %s766_s16, 8 }
  0x18   : > { %p861_p12 = por %p126_p10, %p64_p5  ;;  %s867_s29 = sand.u32 1, %s746_s11  }
  0x19   : > { %s870_s30 = scalar_select %p49_p11, %s746_s11, %s51_s21  }
  0x1a   : > { %s485_s3 = sshll.u32 %s867_s29, 4  ;;  %s486_s4 = sshll.u32 %s758_s14, 2 }
  0x1b   : > { %s487_s5 = sshll.u32 %s762_s15, 4  ;;  %s150_s6 = scalar_lea.vmem [#allocation5], %s485_s3 }
  0x1c   : > { %s161_s7 = sshll.u32 %s150_s6, 4  ;;  %s158_s8 = sadd.s32 %s487_s5, %s486_s4  ;;  %s162_s7 = int_to_ptr.vmem [resolvable:$true] %s161_s7 }
  0x1d   : > { %s488_s17 = sshll.u32 %s158_s8, 6  ;;  %p879_p0 = pnand %p538_p13, %p843_p3 }
  0x1e   : > { %s993_s0 = sld [smem:[#allocation16_spill]]  ;;  %s147_s27 = scalar_lea.sflag [#allocation6], %s867_s29 }
  0x1f   : > { %p612_p1 = pneg %p879_p0  ;;  %s623_s20 = scalar_lea.vmem %s162_s7, 256 }
  0x20   : > { %p624_p2 = scmp.ne.s32.totalorder %s162_s7, %s623_s20  ;;  %s768_s23 = smov [#allocation5]  }
  0x21   : > { %s628_s4 = sshll.u32 %s768_s23, 4  ;;  %s629_s4 = int_to_ptr.vmem [resolvable:$false] %s628_s4 }
  0x22   : > { %p626_p4 = pnand %p624_p2, %p612_p1  ;;  %s630_s5 = scalar_lea.vmem %s629_s4, 512 }
  0x23   : > { %p631_p3 = scmp.lt.s32.totalorder %s162_s7, %s629_s4  ;;  %p632_p6 = scmp.lt.s32.totalorder %s630_s5, %s623_s20 }
  0x24   : > { %s160_s21 = scalar_lea.hbm %s993_s0, %s488_s17  ;;  %p627_p5 = pneg %p626_p4 }
  0x25   : > { %p633_p7 = por %p632_p6, %p631_p3 }
  0x27   : > { %p634_p10 = pnand %p633_p7, %p627_p5 }
  0x29   : > { %637 = shalt.err (!%p634_p10)
}
  0x2a   : > { %s769_s6 = smov 64   ;;  %s770_s8 = smov 4  }
  0x2b   : > { %530 = dma.hbm_to_vmem [thread:$0]  (!%p879_p0), %s160_s21, 256, %s162_s7, %s147_s27, %s769_s6, %s769_s6, %s770_s8  }
  0x2c   : > { %p493_p11 = scmp.ge.s32.totalorder %s766_s16, 1  ;;  %p194_p13 = scmp.lt.s32.totalorder %s766_s16, 9 }
  0x2d   : > { %s185_s23 = scalar_lea.hbm %s981_s1, %s488_s17  ;;  %s175_s4 = scalar_lea.vmem [#allocation8], %s485_s3 }
  0x2e   : > { %p896_p2 = pnand %p493_p11, %p194_p13  ;;  %s186_s5 = sshll.u32 %s175_s4, 4  ;;  %s187_s5 = int_to_ptr.vmem [resolvable:$true] %s186_s5 }
  0x2f   : > { %s172_s0 = scalar_lea.sflag [#allocation9], %s867_s29  ;;  %s651_s19 = scalar_lea.vmem %s187_s5, 256 }
  0x30   : > { %p652_p4 = scmp.ne.s32.totalorder %s187_s5, %s651_s19  ;;  %s771_s7 = smov [#allocation8]  }
  0x31   : > { %s656_s21 = sshll.u32 %s771_s7, 4  ;;  %s657_s21 = int_to_ptr.vmem [resolvable:$false] %s656_s21 }
  0x32   : > { %p654_p5 = pnand %p652_p4, %p612_p1  ;;  %s658_s27 = scalar_lea.vmem %s657_s21, 512 }
  0x33   : > { %p659_p6 = scmp.lt.s32.totalorder %s187_s5, %s657_s21  ;;  %p660_p7 = scmp.lt.s32.totalorder %s658_s27, %s651_s19 }
  0x34   : > { %p655_p3 = pneg %p654_p5 }
  0x35   : > { %p661_p10 = por %p660_p7, %p659_p6 }
  0x37   : > { %p662_p11 = pnand %p661_p10, %p655_p3 }
  0x39   : > { %665 = shalt.err (!%p662_p11)
}
  0x3a   : > { %533 = dma.hbm_to_vmem [thread:$0]  (!%p879_p0), %s185_s23, 256, %s187_s5, %s172_s0, %s769_s6, %s769_s6, %s770_s8  }
  0x3b   : > { %198 = sbr.rel (%p896_p2) target bundleno = 368 (0x170), region = 28  ;;  %s914_s29 = sand.u32 (!%p896_p2), 1, %s742_s10  }
  0x3c   : > { %s494_s3 = sshll.u32 (!%p896_p2), %s914_s29, 4  ;;  %s201_s17 = scalar_lea.sflag (!%p896_p2), [#allocation6], %s914_s29 }
  0x3d   : > { %s204_s20 = scalar_lea.vmem (!%p896_p2), [#allocation5], %s494_s3 }
  0x40   : > { %725 = dma.done.wait (%p851_p8), %s201_s17, 256  }
  0x41   : > { %727 = vsyncadd (%p851_p8), %s201_s17, 4294967040  ;;  %s210_s0 = scalar_lea.sflag [#allocation9], %s914_s29  ;;  %s213_s19 = scalar_lea.vmem [#allocation8], %s494_s3 }
  0x42   : > { %729 = dma.done.wait (%p851_p8), %s210_s0, 256  }
  0x43   : > { %731 = vsyncadd (%p851_p8), %s210_s0, 4294967040  ;;  %v250_v0 = vld [vmem:[%s204_s20] sm:$0xf]  ;;  %v251_v1 = vld [vmem:[%s204_s20 + $0x4] sm:$0xf]  ;;  %v772_v5 = vmov 0  }
  0x44   : > { %v252_v2 = vld [vmem:[%s204_s20 + $0x8] sm:$0xf]  ;;  %v253_v3 = vld [vmem:[%s204_s20 + $0xc] sm:$0xf]  ;;  %vm262_vm0 = vcmp.ne.bf16.partialorder %v250_v0, 0  ;;  %vm263_vm1 = vcmp.ne.bf16.partialorder %v251_v1, 0 }
  0x45   : > { %vm264_vm2 = vcmp.ne.bf16.partialorder %v252_v2, 0  ;;  %v505_v4 = vld [vmem:[%s213_s19] sm:$0xff]   ;;  %vm265_vm3 = vcmp.ne.bf16.partialorder %v253_v3, 0  ;;  %v266_v6 = vsel %vm262_vm0, 65537, %v772_v5  ;;  %v267_v7 = vsel %vm263_vm1, 65537, %v772_v5  ;;  %v512_v9 = vld [vmem:[%s213_s19 + $0x8] sm:$0xff]  }
  0x46   : > { %v268_v8 = vsel %vm264_vm2, 65537, %v772_v5  ;;  %v269_v10 = vsel %vm265_vm3, 65537, %v772_v5  ;;  %v270_v11 = vunpack.c.l.b16 %v266_v6  ;;  %v271_v12 = vunpack.c.l.b16 %v267_v7  ;;  %s500_s8 = sshll.u32 %s754_s13, 2  ;;  %s237_s7 = scalar_lea.vmem [#allocation10], %s914_s29 }
  0x47   : > { %v272_v13 = vunpack.c.l.b16 %v268_v8  ;;  %v273_v14 = vunpack.c.l.b16 %v269_v10  ;;  %v506_v15 = vunpack.c.l.bf16 %v505_v4  ;;  %v507_v16 = vunpack.c.h.bf16 %v505_v4  ;;  %s362_s26 = sadd.s32 %s750_s12, %s500_s8  ;;  %s366_s21 = sshll.u32 %s237_s7, 4  ;;  %s367_s21 = int_to_ptr.vmem [resolvable:$true] %s366_s21 }
  0x48   : > { %vm274_vm4 = vcmp.ne.s32.totalorder %v270_v11, 0  ;;  %vm275_vm5 = vcmp.ne.s32.totalorder %v271_v12, 0  ;;  %v510_v17 = vunpack.c.l.bf16 %v512_v9  ;;  %v773_v18 = vmov 0.0   ;;  %s501_s4 = sshll.u32 %s362_s26, 4  ;;  %s352_s13 = scalar_lea.sflag [#allocation7], %s914_s29 }
  0x49   : > { %vm276_vm6 = vcmp.ne.s32.totalorder %v272_v13, 0  ;;  %vm277_vm7 = vcmp.ne.s32.totalorder %v273_v14, 0  ;;  %v496_v19 = vsel %vm274_vm4, 1.0, %v773_v18  ;;  %v497_v20 = vsel %vm275_vm5, 1.0, %v773_v18  ;;  %s933_s20 = scalar_lea.hbm %s982_s2, %s501_s4  ;;  %s666_s0 = scalar_lea.vmem %s367_s21, 16 }
  0x4a   : > { %v498_v21 = vsel %vm276_vm6, 1.0, %v773_v18  ;;  %v291_v22 = vadd.f32 %v497_v20, %v496_v19  ;;  %v297_v23 = vadd.f32 %v507_v16, %v506_v15  ;;  %v286_v24 = vsel %vm274_vm4, %v506_v15, 0.0  ;;  %p667_p0 = scmp.ne.s32.totalorder %s367_s21, %s666_s0  ;;  %s774_s12 = smov [#allocation10]  }
  0x4b   : > { %v499_v25 = vsel %vm277_vm7, 1.0, %v773_v18  ;;  %v511_v26 = vunpack.c.h.bf16 %v512_v9  ;;  %v287_v27 = vsel %vm275_vm5, %v507_v16, 0.0  ;;  %v288_v28 = vsel %vm276_vm6, %v510_v17, 0.0  ;;  %s670_s19 = sshll.u32 %s774_s12, 4  ;;  %s671_s19 = int_to_ptr.vmem [resolvable:$false] %s670_s19 }
  0x4c   : > { %v292_v29 = vadd.f32 %v498_v21, %v291_v22  ;;  %v298_v30 = vadd.f32 %v510_v17, %v297_v23  ;;  %v303_v31 = vadd.f32 %v287_v27, %v286_v24  ;;  %p668_p1 = pnand %p667_p0, %p855_p9  ;;  %p673_p2 = scmp.lt.s32.totalorder %s367_s21, %s671_s19 }
  0x4d   : > { %v289_v32 = vsel %vm277_vm7, %v511_v26, 0.0 }
  0x4e   : > { %v293_v33 = vadd.f32 %v499_v25, %v292_v29  ;;  %v304_v34 = vadd.f32 %v303_v31, %v288_v28  ;;  %v299_v35 = vadd.f32 %v511_v26, %v298_v30  ;;  %p669_p13 = pneg %p668_p1 }
  0x50   : > { %312 = vadd.xlane.f32.xlu0 %v293_v33  ;;  %v305_v36 = vadd.f32 %v304_v34, %v289_v32 }
  0x52   : > { %332 = vadd.xlane.f32.xlu1 %v305_v36 }
  0x54   : > { %322 = vadd.xlane.f32.xlu0 %v299_v35 }
  0xd9   : > { %v313_v37 = vpop.xlane.xlu0 %312 }
  0xda   : > { %v314_v38 = vrot.slane %v313_v37, 4 }
  0xdb   : > { %v333_v39 = vpop.xlane.xlu1 %332 }
  0xdc   : > { %v315_v40 = vadd.f32 %v314_v38, %v313_v37  ;;  %v334_v41 = vrot.slane %v333_v39, 4 }
  0xdd   : > { %v323_v42 = vpop.xlane.xlu0 %322 }
  0xde   : > { %v316_v43 = vrot.slane %v315_v40, 2  ;;  %v324_v44 = vrot.slane %v323_v42, 4  ;;  %v335_v45 = vadd.f32 %v334_v41, %v333_v39 }
  0xe0   : > { %v325_v46 = vadd.f32 %v324_v44, %v323_v42  ;;  %v317_v47 = vadd.f32 %v316_v43, %v315_v40  ;;  %v336_v48 = vrot.slane %v335_v45, 2 }
  0xe2   : > { %v326_v49 = vrot.slane %v325_v46, 2  ;;  %v318_v50 = vrot.slane %v317_v47, 1  ;;  %v337_v51 = vadd.f32 %v336_v48, %v335_v45 }
  0xe4   : > { %v327_v52 = vadd.f32 %v326_v49, %v325_v46  ;;  %v319_v53 = vadd.f32 %v318_v50, %v317_v47  ;;  %v338_v54 = vrot.slane %v337_v51, 1 }
  0xe6   : > { %513 = vpush %v319_v53  ;;  %v328_v55 = vrot.slane %v327_v52, 1  ;;  %v339_v56 = vadd.f32 %v338_v54, %v337_v51 }
  0xe8   : > { %v329_v57 = vadd.f32 %v328_v55, %v327_v52 }
  0xea   : > { %515 = vpush %v329_v57 }
  0xeb   : > { %517 = vpush %v339_v56 }
 0x117   : > { %s514_s24 = spop %513 }
 0x11b   : > { %s516_s18 = spop %515 }
 0x11c   : > { %s341_s6 = sadd.f32 %s516_s18, %s514_s24  ;;  %s518_s22 = spop %517 }
 0x11d   : > { %s342_s23 = smul.f32 2.0, %s518_s22  ;;  %p347_p8 = scmp.gt.f32.partialorder %s516_s18, 0.0 }
 0x11e   : > { %v343_v58 = vstv %s341_s6  ;;  %s672_s24 = scalar_lea.vmem %s671_s19, 32 }
 0x11f   : > { %608 = vrcp.f32 %v343_v58  ;;  %p674_p4 = scmp.lt.s32.totalorder %s672_s24, %s666_s0 }
 0x121   : > { %p675_p5 = por %p674_p4, %p673_p2 }
 0x123   : > { %p676_p3 = pnand %p675_p5, %p669_p13 }
 0x12c   : > { %v609_v59 = vpop.eup %608 }
 0x12d   : > { %519 = vpush %v609_v59 }
 0x15e   : > { %s520_s5 = spop %519 }
 0x15f   : > { %s346_s27 = smul.f32 %s520_s5, %s342_s23 }
 0x161   : > { %s1011_s27 = smov (!%p347_p8, %s346_s27), nan }
 0x162   : > { %v349_v60 = vstv %s1011_s27 }
 0x163   : > { %350 = vst [vmem:[%s237_s7] sm:$0x1] %v349_v60 }
 0x164   : > { %679 = shalt.err (!%p676_p3)
}
 0x165   : > { %s680_s18 = scalar_lea.hbm %s933_s20, 16  ;;  %s684_s8 = scalar_lea.hbm %s982_s2, 128 }
 0x166   : > { %p681_p6 = scmp.ne.s32.totalorder %s933_s20, %s680_s18  ;;  %p685_p11 = scmp.lt.s32.totalorder %s933_s20, %s982_s2 }
 0x167   : > { %p686_p8 = scmp.lt.s32.totalorder %s684_s8, %s680_s18 }
 0x168   : > { %p682_p7 = pnand %p681_p6, %p855_p9 }
 0x169   : > { %p687_p0 = por %p686_p8, %p685_p11 }
 0x16a   : > { %p683_p10 = pneg %p682_p7 }
 0x16c   : > { %p688_p1 = pnand %p687_p0, %p683_p10 }
 0x16e   : > { %691 = shalt.err (!%p688_p1)
}
 0x16f   : > { %525 = dma.vmem_to_hbm [thread:$0]  (%p855_p9), %s367_s21, 16, %s933_s20, %s352_s13  }
 0x170 PF: > { %p539_p13 = scmp.ge.s32.totalorder %s766_s16, 2  ;;  %s378_s23 = sand.u32 1, %s738_s9  }
 0x171   : > { %s379_s4 = scalar_lea.sflag [#allocation7], %s378_s23 }
 0x172   : > { %p535_p2 = pnand %p539_p13, %p861_p12 }
 0x174   : > { %p536_p4 = pneg %p535_p2 }
 0x176   : > { %733 = dma.done.wait (%p536_p4), %s379_s4, 16  }
 0x177   : > { %735 = vsyncadd (%p536_p4), %s379_s4, 4294967280  ;;  %s21_s16 = sadd.s32 1, %s766_s16   ;;  %s995_s25 = sld [smem:[#allocation14_spill]] }
 0x178   : > { %p18_p5 = scmp.ge.s32.totalorder %s21_s16, 10   ;;  %s996_s5 = sld [smem:[#allocation15_spill]] }
 0x179   : > { %s997_s9 = smov %s742_s10  ;;  %s998_s10 = smov %s746_s11 }
 0x17a   : > { %s999_s11 = smov %s870_s30  ;;  %s1000_s12 = smov %s758_s14 }
 0x17b   : > { %s1001_s13 = smov %s762_s15  ;;  %20 = sbr.rel (!%p18_p5) target bundleno = 11 (0xb), region = 94 }
 0x17d   : > { %s1002_s14 = smov %s995_s25 }
 0x17e   : > { %s1003_s15 = smov %s996_s5 }
 0x180   :  { %383 = vsyncpa [#allocation6], 1 }
 0x181   :  { %385 = vsyncpa [#allocation6 + $0x1], 1 }
 0x182   :  { %386 = vsyncpa [#allocation9], 1 }
 0x183   :  { %388 = vsyncpa [#allocation9 + $0x1], 1 }
 0x184   :  { %389 = vsyncpa [#allocation7], 1 }
 0x185   :  { %391 = vsyncpa [#allocation7 + $0x1], 1 }

</bundles_post_ra>
